<compile_context>
chip_gen: v7x
topology: tpu7x:2x2x1
jax: 0.10.0
libtpu: 0.0.40
codegen_flags: <defaults>
</compile_context>

<pallas_src>
import jax
import jax.numpy as jnp
import numpy as np
from jax.experimental import pallas as pl
from jax.experimental.pallas import tpu as pltpu


def _axial_pos_kernel(w0_ref, w1_ref, out_ref):
    """One grid step writes TS1 first-axis rows = TS1*S2 sequence rows.

    w0_ref : (TS1, 1, H)  lane-padded chunk of the first-axis table (cols D1: are 0)
    w1_ref : (1, S2, H)   lane-padded full second-axis table (cols :D1 are 0)
    out_ref: (TS1, S2, H) output block (lane axis = hidden, full-lane store)
    """
    out_ref[...] = (w0_ref[...] + w1_ref[...]).astype(out_ref.dtype)


def _vmem_capacity_bytes():
    """Physical VMEM of the current chip; conservative fallback if unknown."""
    try:
        return int(pltpu.get_tpu_info().vmem_capacity_bytes)
    except Exception:
        return 64 << 20  # v7x-class assumption


def _pick_ts1(s1_used, row_group_bytes, target_bytes):
    """Largest divisor of s1_used whose (TS1, S2, hidden) output block fits the
    byte budget, preferring an even number of grid blocks so a "parallel" grid
    axis can be sharded across v7x's two TensorCores."""
    divisors = [d for d in range(1, s1_used + 1) if s1_used % d == 0]
    fitting = [d for d in divisors if d * row_group_bytes <= target_bytes] or [1]
    even_blocks = [d for d in fitting if (s1_used // d) % 2 == 0]
    return max(even_blocks) if even_blocks else max(fitting)


def axial_position_embeddings(position_ids, w0, w1, axial_pos_shape,
                              out_dtype=None, block_bytes_target=None):
    """Pallas-backed equivalent of AxialPositionEmbeddings.forward (eval path).

    position_ids: (B, seq_len) int array (only the shape is used, as in PyTorch)
    w0: (S1, D1) float, w1: (S2, D2) float   (squeezed PyTorch weights)
    returns: (B, seq_len, D1 + D2)
    """
    batch_size, seq_len = position_ids.shape
    S1, S2 = axial_pos_shape
    D1 = w0.shape[-1]
    D2 = w1.shape[-1]
    hidden = D1 + D2
    assert S1 * S2 >= seq_len, "axial_pos_shape must multiply to at least seq_len"
    out_dtype = jnp.dtype(w0.dtype if out_dtype is None else out_dtype)
    in_dtype = jnp.dtype(w0.dtype)

    vmem_phys = _vmem_capacity_bytes()
    if block_bytes_target is None:
        # v5e/v6e (128 MiB VMEM): larger blocks -> fewer grid steps, longer DMAs.
        # v7x (64 MiB VMEM): keep blocks at ~8 MiB so 2x output buffers fit.
        block_bytes_target = (24 << 20) if vmem_phys >= (96 << 20) else (8 << 20)

    # Only the first ceil(seq_len / S2) rows of the first axial axis are needed.
    S1_used = -(-seq_len // S2)
    row_group_bytes = S2 * hidden * out_dtype.itemsize
    TS1 = _pick_ts1(S1_used, row_group_bytes, block_bytes_target)
    num_blocks = S1_used // TS1

    # Lane-pad both tables to the full hidden width into disjoint column ranges,
    # shaped like the PyTorch parameters: (S1_used, 1, H) and (1, S2, H).
    # These are tiny ((S1_used + S2) * H elements) relative to the output.
    w0p = jnp.pad(w0[:S1_used], ((0, 0), (0, D2)))[:, None, :]
    w1p = jnp.pad(w1, ((0, 0), (D1, 0)))[None, :, :]

    out_block_bytes = TS1 * S2 * hidden * out_dtype.itemsize
    in_block_bytes = (TS1 + S2) * hidden * in_dtype.itemsize
    needed = 2 * (out_block_bytes + in_block_bytes) + (4 << 20)
    vmem_cap = (48 << 20) if vmem_phys <= (64 << 20) else (96 << 20)
    if needed <= vmem_cap:
        vmem_limit = int(min(max(needed, 16 << 20), vmem_cap))
    else:  # pathological single-row-group case; give the compiler what it needs
        vmem_limit = int(needed)

    enc3d = pl.pallas_call(
        _axial_pos_kernel,
        out_shape=jax.ShapeDtypeStruct((S1_used, S2, hidden), out_dtype),
        grid_spec=pltpu.PrefetchScalarGridSpec(
            num_scalar_prefetch=0,
            grid=(num_blocks,),
            in_specs=[
                pl.BlockSpec((TS1, 1, hidden), lambda i: (i, 0, 0)),  # w0 chunk
                pl.BlockSpec((1, S2, hidden), lambda i: (0, 0, 0)),   # full w1
            ],
            out_specs=pl.BlockSpec((TS1, S2, hidden), lambda i: (i, 0, 0)),
        ),
        compiler_params=pltpu.CompilerParams(
            dimension_semantics=("parallel",),
            vmem_limit_bytes=vmem_limit,
        ),
    )(w0p, w1p)

    # Metadata flatten; the <= S2-1 tail-row drop and the batch broadcast are
    # kept outside the kernel so they can fuse into the consumer in a real model.
    enc = enc3d.reshape(S1_used * S2, hidden)
    if S1_used * S2 != seq_len:
        enc = enc[:seq_len]
    return jnp.broadcast_to(enc[None, :, :], (batch_size, seq_len, hidden))


def _reference(position_ids, w0, w1, axial_pos_shape):
    """Pure-JAX reference mirroring the PyTorch eval-path forward."""
    batch_size, seq_len = position_ids.shape
    S1, S2 = axial_pos_shape
    b0 = jnp.broadcast_to(w0[None, :, None, :], (batch_size, S1, S2, w0.shape[-1]))
    b1 = jnp.broadcast_to(w1[None, None, :, :], (batch_size, S1, S2, w1.shape[-1]))
    enc = jnp.concatenate([b0, b1], axis=-1)
    return enc.reshape(batch_size, S1 * S2, -1)[:, :seq_len]


if __name__ == "__main__":
    key = jax.random.PRNGKey(0)
    k0, k1, k2, k3 = jax.random.split(key, 4)

    # Case 1: hidden = 128 (lane-dense output), seq_len NOT a multiple of S2
    #         -> exercises the "only S1_used rows" path and the tail slice.
    axial_pos_shape = (4, 8)
    axial_pos_embds_dim = (32, 96)          # hidden = 128
    batch_size, seq_len = 2, 20             # <= S1 * S2 = 32
    w0 = jax.random.normal(k0, (axial_pos_shape[0], axial_pos_embds_dim[0]),
                           dtype=jnp.float32)
    w1 = jax.random.normal(k1, (axial_pos_shape[1], axial_pos_embds_dim[1]),
                           dtype=jnp.float32)
    position_ids = jnp.broadcast_to(
        jnp.arange(seq_len, dtype=jnp.int32)[None, :], (batch_size, seq_len))

    out = jax.block_until_ready(
        axial_position_embeddings(position_ids, w0, w1, axial_pos_shape))
    ref = _reference(position_ids, w0, w1, axial_pos_shape)
    np.testing.assert_allclose(np.asarray(out), np.asarray(ref),
                               rtol=1e-6, atol=1e-6)

    # Case 2: multi-block grid (tiny block budget forces TS1 < S1_used, and an
    #         even number of blocks) with seq_len an exact multiple of S2.
    axial_pos_shape2 = (16, 8)
    axial_pos_embds_dim2 = (32, 96)
    batch_size2, seq_len2 = 3, 128          # = S1 * S2
    w0b = jax.random.normal(k2, (axial_pos_shape2[0], axial_pos_embds_dim2[0]),
                            dtype=jnp.float32)
    w1b = jax.random.normal(k3, (axial_pos_shape2[1], axial_pos_embds_dim2[1]),
                            dtype=jnp.float32)
    position_ids2 = jnp.broadcast_to(
        jnp.arange(seq_len2, dtype=jnp.int32)[None, :], (batch_size2, seq_len2))

    out2 = jax.block_until_ready(
        axial_position_embeddings(position_ids2, w0b, w1b, axial_pos_shape2,
                                  block_bytes_target=32 * 1024))
    ref2 = _reference(position_ids2, w0b, w1b, axial_pos_shape2)
    np.testing.assert_allclose(np.asarray(out2), np.asarray(ref2),
                               rtol=1e-6, atol=1e-6)

    # Case 3: bf16 output (halves HBM write bytes); cast happens in the store,
    #         so it must bit-match a plain f32->bf16 cast of the reference.
    out3 = jax.block_until_ready(
        axial_position_embeddings(position_ids2, w0b, w1b, axial_pos_shape2,
                                  out_dtype=jnp.bfloat16))
    np.testing.assert_array_equal(
        np.asarray(out3), np.asarray(ref2.astype(jnp.bfloat16)))

    print("KERNEL_OK")
</pallas_src>

<mosaic_0001>
module attributes {stable_mosaic.version = 11 : i64} {
  func.func @_axial_pos_kernel(%arg0: i32, %arg1: memref<3x1x128xf32, #tpu.memory_space<vmem>>, %arg2: memref<1x8x128xf32, #tpu.memory_space<vmem>>, %arg3: memref<3x8x128xf32, #tpu.memory_space<vmem>>) attributes {dimension_semantics = [#tpu.dimension_semantics<parallel>], iteration_bounds = array<i64: 1>, scalar_prefetch = 0 : i64, scratch_operands = 0 : i64, tpu.core_type = #tpu.core_type<tc>, window_params = [{transform_indices = @transform_0, window_bounds = array<i64: 3, 1, 128>}, {pipeline_mode = #tpu.pipeline_mode<synchronous>, transform_indices = @transform_1, window_bounds = array<i64: 1, 8, 128>}, {transform_indices = @transform_2, window_bounds = array<i64: 3, 8, 128>}]} {
    %c0 = arith.constant 0 : index
    %c0_0 = arith.constant 0 : index
    %c0_1 = arith.constant 0 : index
    %0 = vector.load %arg1[%c0, %c0_0, %c0_1] : memref<3x1x128xf32, #tpu.memory_space<vmem>>, vector<3x1x128xf32>
    %c0_2 = arith.constant 0 : index
    %c0_3 = arith.constant 0 : index
    %c0_4 = arith.constant 0 : index
    %1 = vector.load %arg2[%c0_2, %c0_3, %c0_4] : memref<1x8x128xf32, #tpu.memory_space<vmem>>, vector<1x8x128xf32>
    %2 = vector.broadcast %0 : vector<3x1x128xf32> to vector<3x8x128xf32>
    %3 = vector.broadcast %1 : vector<1x8x128xf32> to vector<3x8x128xf32>
    %4 = arith.addf %2, %3 : vector<3x8x128xf32>
    %c0_5 = arith.constant 0 : index
    %c0_6 = arith.constant 0 : index
    %c0_7 = arith.constant 0 : index
    %5 = vector.load %arg3[%c0_5, %c0_6, %c0_7] : memref<3x8x128xf32, #tpu.memory_space<vmem>>, vector<3x8x128xf32>
    tpu.vector_store %arg3[%c0_5, %c0_6, %c0_7], %4 {strides = array<i32>} : memref<3x8x128xf32, #tpu.memory_space<vmem>>, vector<3x8x128xf32>,
    return
  }
  func.func @transform_0(%arg0: i32) -> (i32, i32, i32) {
    %c0_i32 = arith.constant 0 : i32
    %c0_i32_0 = arith.constant 0 : i32
    %c0_i32_1 = arith.constant 0 : i32
    return %arg0, %c0_i32, %c0_i32_0 : i32, i32, i32
  }
  func.func @transform_1(%arg0: i32) -> (i32, i32, i32) {
    %c0_i32 = arith.constant 0 : i32
    %c0_i32_0 = arith.constant 0 : i32
    %c0_i32_1 = arith.constant 0 : i32
    %c0_i32_2 = arith.constant 0 : i32
    return %c0_i32, %c0_i32_0, %c0_i32_1 : i32, i32, i32
  }
  func.func @transform_2(%arg0: i32) -> (i32, i32, i32) {
    %c0_i32 = arith.constant 0 : i32
    %c0_i32_0 = arith.constant 0 : i32
    %c0_i32_1 = arith.constant 0 : i32
    return %arg0, %c0_i32, %c0_i32_0 : i32, i32, i32
  }
}

</mosaic_0001>

<bundles_post_ra>
// kernel: tpu_custom_call.1
= control target key start
LH: loop header
LB: loop body
LE: loop exit
PB: predicated region body
PF: predicated region fallthrough
CT: control target
= control target key end

     0   :  { %7 = vsyncpa [#allocation3], 0  ;;  %s224_s0 = inlined_call_operand.hbm [shape: f32[3,1,128], index: 0, kind: input, shape index: {}]   ;;  %s225_s1 = inlined_call_operand.hbm [shape: f32[1,8,128], index: 1, kind: input, shape index: {}]   ;;  %s226_s2 = inlined_call_operand.hbm [shape: f32[3,8,128], index: 2, kind: output, shape index: {}]  }
   0x1   :  { %8 = vsyncpa [#allocation6], 0 }
   0x2   :  { %9 = vsyncpa [#allocation4], 0  ;;  %s166_s9 = smov [#allocation2]   ;;  %s94_s13 = scalar_lea.hbm %s224_s0, 48 }
   0x3   :  { %s15_s10 = sshll.u32 %s166_s9, 4  ;;  %p95_p0 = scmp.ne.s32.totalorder %s224_s0, %s94_s13  ;;  %s16_s10 = int_to_ptr.vmem [resolvable:$true] %s15_s10 }
   0x4   :  { %p98_p1 = scmp.lt.u32.totalorder %s94_s13, %s224_s0 }
   0x6   :  { %p100_p2 = pnand %p98_p1, %p95_p0 }
   0x8   :  { %103 = shalt.err (!%p100_p2)
}
   0x9   :  { %s104_s18 = scalar_lea.vmem %s16_s10, 48  ;;  %s108_s19 = scalar_lea.vmem %s16_s10, 64 }
   0xa   :  { %p105_p3 = scmp.ne.s32.totalorder %s16_s10, %s104_s18  ;;  %p109_p4 = scmp.lt.s32.totalorder %s16_s10, %s16_s10 }
   0xb   :  { %p110_p5 = scmp.lt.s32.totalorder %s108_s19, %s104_s18 }
   0xd   :  { %p111_p6 = por %p110_p5, %p109_p4 }
   0xf   :  { %p112_p7 = pnand %p111_p6, %p105_p3 }
  0x11   :  { %115 = shalt.err (!%p112_p7)
}
  0x12   :  { %s167_s20 = smov 16   ;;  %s168_s21 = smov 1  }
  0x13   :  { %21 = dma.hbm_to_vmem [thread:$0]  %s224_s0, 48, %s16_s10, [#allocation3], %s167_s20, %s167_s20, %s168_s21  }
  0x14   :  { %s169_s24 = smov [#allocation5]   ;;  %s116_s28 = scalar_lea.hbm %s225_s1, 128 }
  0x15   :  { %s28_s25 = sshll.u32 %s169_s24, 4  ;;  %p117_p8 = scmp.ne.s32.totalorder %s225_s1, %s116_s28  ;;  %s29_s25 = int_to_ptr.vmem [resolvable:$true] %s28_s25 }
  0x16   :  { %p120_p9 = scmp.lt.u32.totalorder %s116_s28, %s225_s1 }
  0x18   :  { %p122_p10 = pnand %p120_p9, %p117_p8 }
  0x1a   :  { %125 = shalt.err (!%p122_p10)
}
  0x1b   :  { %s126_s5 = scalar_lea.vmem %s29_s25, 128  ;;  %p131_p12 = scmp.lt.s32.totalorder %s29_s25, %s29_s25 }
  0x1c   :  { %p127_p11 = scmp.ne.s32.totalorder %s29_s25, %s126_s5  ;;  %p132_p13 = scmp.lt.s32.totalorder %s126_s5, %s126_s5 }
  0x1e   :  { %p133_p0 = por %p132_p13, %p131_p12 }
  0x20   :  { %p134_p1 = pnand %p133_p0, %p127_p11 }
  0x22   :  { %137 = shalt.err (!%p134_p1)
}
  0x23   :  { %31 = dma.hbm_to_vmem [thread:$0]  %s225_s1, 128, %s29_s25, [#allocation6]  }
  0x24   :  { %160 = dma.done.wait [#allocation3], 48  }
  0x25   :  { %161 = vsyncadd [#allocation3], 4294967248 }
  0x26   :  { %162 = dma.done.wait [#allocation6], 128  }
  0x27   :  { %163 = vsyncadd [#allocation6], 4294967168  ;;  %s170_s7 = smov [#allocation7]   ;;  %v84_v0 = vld [vmem:[#allocation2] ss:$0 sm:$0xff]  ;;  %v41_v1 = vld [vmem:[#allocation5] sm:$0xff] }
  0x28   :  { %s71_s8 = sshll.u32 %s170_s7, 4  ;;  %v85_v2 = vld [vmem:[#allocation2 + $0x1] ss:$0 sm:$0xff]  ;;  %v60_v3 = vadd.f32 %v84_v0, %v41_v1  ;;  %v86_v5 = vld [vmem:[#allocation2 + $0x2] ss:$0 sm:$0xff]  ;;  %s72_s8 = int_to_ptr.vmem [resolvable:$true] %s71_s8 }
  0x29   :  { %v61_v4 = vadd.f32 %v85_v2, %v41_v1  ;;  %v62_v6 = vadd.f32 %v86_v5, %v41_v1  ;;  %s138_s9 = scalar_lea.vmem %s72_s8, 384  ;;  %p143_p3 = scmp.lt.s32.totalorder %s72_s8, %s72_s8 }
  0x2a   :  { %63 = vst [vmem:[#allocation7] sm:$0xff] %v60_v3  ;;  %p139_p2 = scmp.ne.s32.totalorder %s72_s8, %s138_s9  ;;  %p144_p4 = scmp.lt.s32.totalorder %s138_s9, %s138_s9 }
  0x2b   :  { %64 = vst [vmem:[#allocation7 + $0x8] sm:$0xff] %v61_v4  ;;  %65 = vst [vmem:[#allocation7 + $0x10] sm:$0xff] %v62_v6 }
  0x2c   :  { %p145_p5 = por %p144_p4, %p143_p3 }
  0x2e   :  { %p146_p6 = pnand %p145_p5, %p139_p2 }
  0x30   :  { %149 = shalt.err (!%p146_p6)
}
  0x31   :  { %s150_s11 = scalar_lea.hbm %s226_s2, 384 }
  0x32   :  { %p151_p7 = scmp.ne.s32.totalorder %s226_s2, %s150_s11  ;;  %p154_p8 = scmp.lt.u32.totalorder %s150_s11, %s226_s2 }
  0x34   :  { %p156_p9 = pnand %p154_p8, %p151_p7 }
  0x36   :  { %159 = shalt.err (!%p156_p9)
}
  0x37   :  { %s171_s16 = smov 128   ;;  %s172_s17 = smov 8  }
  0x38   :  { %77 = dma.vmem_to_hbm [thread:$0]  %s72_s8, 384, %s226_s2, [#allocation4], %s171_s16, %s171_s16, %s172_s17  }
  0x39   :  { %164 = dma.done.wait [#allocation4], 384  }
  0x3a   :  { %165 = vsyncadd [#allocation4], 4294966912 }
  0x3b   :  { %81 = vsyncpa [#allocation3], 1 }
  0x3c   :  { %82 = vsyncpa [#allocation6], 1 }
  0x3d   :  { %83 = vsyncpa [#allocation4], 1 }

</bundles_post_ra>
